<compile_context>
chip_gen: v7x
topology: tpu7x:2x2x1
jax: 0.10.0
libtpu: 0.0.40
codegen_flags: <defaults>
</compile_context>

<pallas_src>
import functools

import jax
import jax.numpy as jnp
import numpy as np
from jax.experimental import pallas as pl
from jax.experimental.pallas import tpu as pltpu


def _cosface_kernel(x_ref, w_ref, label_ref, o_ref, xn_ref, *, s, sm):
    """One (TILE_B, TILE_C) output tile.

    x_ref:     (TILE_B, D)  input features
    w_ref:     (TILE_C, D)  class weights tile
    label_ref: (TILE_B, 1)  int32 labels
    o_ref:     (TILE_B, TILE_C) f32 output tile
    xn_ref:    (TILE_B, D)  VMEM scratch caching normalized x (matmul dtype)
    """
    j = pl.program_id(1)
    eps_sq = jnp.float32(1e-24)  # == (F.normalize eps 1e-12)**2

    # Cache normalized x once per B-row tile: the C axis (axis 1) is the
    # innermost, sequentially-executed ("arbitrary") grid axis, so j == 0 runs
    # before any other j for a given i on each core.
    @pl.when(j == 0)
    def _():
        x = x_ref[...].astype(jnp.float32)
        inv = jax.lax.rsqrt(
            jnp.maximum(jnp.sum(x * x, axis=-1, keepdims=True), eps_sq))
        xn_ref[...] = (x * inv).astype(xn_ref.dtype)

    # Normalize this W tile (f32 math, cast to MXU feed dtype).
    w = w_ref[...].astype(jnp.float32)
    w_inv = jax.lax.rsqrt(
        jnp.maximum(jnp.sum(w * w, axis=-1, keepdims=True), eps_sq))
    w_n = (w * w_inv).astype(xn_ref.dtype)

    # cosine = x_n @ w_n.T, contracting the last (lane) axis of both operands
    # -> no XLU transpose / re-materialization of the W tile.
    cosine = jax.lax.dot_general(
        xn_ref[...], w_n,
        dimension_numbers=(((1,), (1,)), ((), ())),
        preferred_element_type=jnp.float32)                  # (TILE_B, TILE_C)

    # one-hot margin: global column index = j * TILE_C + local iota.
    tb, tc = cosine.shape
    cols = jax.lax.broadcasted_iota(jnp.int32, (tb, tc), 1) + j * tc
    one_hot = cols == label_ref[...]                          # (TILE_B, TILE_C)

    # output = s * cosine - (s*m) * one_hot
    scaled = cosine * jnp.float32(s)
    o_ref[...] = (scaled - jnp.where(one_hot, jnp.float32(sm),
                                     jnp.float32(0.0))).astype(o_ref.dtype)


def _round_up(v, mult):
    return (v + mult - 1) // mult * mult


def cosface_forward(x, weight, label, s=64.0, m=0.4,
                    tile_b=None, tile_c=None, matmul_dtype=jnp.bfloat16):
    """x: [B, D] f32, weight: [C, D] f32, label: [B] int -> [B, C] f32."""
    B, D = x.shape
    C, D2 = weight.shape
    assert D == D2

    # Lane-dense, MXU-friendly tiles. Small enough for v7x's 64 MiB VMEM even
    # with double buffering (e.g. 256x512xD=512 f32 tiles -> a few MiB total).
    if tile_b is None:
        tile_b = min(_round_up(B, 8), 256)
    if tile_c is None:
        tile_c = min(_round_up(C, 128), 512)
    assert tile_b % 8 == 0 and tile_c % 128 == 0

    Bp = _round_up(B, tile_b)
    Cp = _round_up(C, tile_c)

    # Pad remainders in the wrapper; padded rows/cols are sliced off below.
    x_p = jnp.pad(x, ((0, Bp - B), (0, 0))) if Bp != B else x
    w_p = jnp.pad(weight, ((0, Cp - C), (0, 0))) if Cp != C else weight
    label_i = label.astype(jnp.int32)
    if Bp != B:
        label_i = jnp.pad(label_i, (0, Bp - B), constant_values=-1)
    label2d = label_i.reshape(Bp, 1)

    nb, nc = Bp // tile_b, Cp // tile_c
    kernel = functools.partial(_cosface_kernel,
                               s=float(s), sm=float(s) * float(m))

    out = pl.pallas_call(
        kernel,
        out_shape=jax.ShapeDtypeStruct((Bp, Cp), jnp.float32),
        grid=(nb, nc),
        in_specs=[
            pl.BlockSpec((tile_b, D), lambda i, j: (i, 0)),   # x
            pl.BlockSpec((tile_c, D), lambda i, j: (j, 0)),   # weight
            pl.BlockSpec((tile_b, 1), lambda i, j: (i, 0)),   # label
        ],
        out_specs=pl.BlockSpec((tile_b, tile_c), lambda i, j: (i, j)),
        scratch_shapes=[pltpu.VMEM((tile_b, D), matmul_dtype)],  # cached x_n
        compiler_params=pltpu.CompilerParams(
            # B axis sharded across TensorCores (v7x megacore); C axis must be
            # sequential ("arbitrary") so the x_n cache is valid.
            dimension_semantics=("parallel", "arbitrary")),
        cost_estimate=pl.CostEstimate(
            flops=2 * Bp * Cp * D,
            bytes_accessed=4 * (Bp * D + Cp * D + Bp * Cp),
            transcendentals=Bp + Cp * nb),
    )(x_p, w_p, label2d)

    return out[:B, :C]


def cosface_reference(x, weight, label, s=64.0, m=0.4):
    xn = x / jnp.maximum(jnp.linalg.norm(x, axis=-1, keepdims=True), 1e-12)
    wn = weight / jnp.maximum(jnp.linalg.norm(weight, axis=-1, keepdims=True),
                              1e-12)
    cosine = xn @ wn.T
    one_hot = jax.nn.one_hot(label, weight.shape[0], dtype=cosine.dtype)
    return s * (one_hot * (cosine - m) + (1.0 - one_hot) * cosine)


if __name__ == "__main__":
    # TODO(synk): the device_id (multi-GPU model-parallel chunking) branch of
    # the PyTorch module is not translated; this implements the device_id=None
    # forward semantics.
    key = jax.random.PRNGKey(0)
    kx, kw, kl = jax.random.split(key, 3)

    B, in_features, out_features = 32, 160, 520
    s_val, m_val = 64.0, 0.4

    x = jax.random.normal(kx, (B, in_features), dtype=jnp.float32)

    # Xavier-uniform init of weight [out_features, in_features]
    bound = float(np.sqrt(6.0 / (in_features + out_features)))
    weight = jax.random.uniform(
        kw, (out_features, in_features), dtype=jnp.float32,
        minval=-bound, maxval=bound)

    label = jax.random.randint(kl, (B,), 0, out_features, dtype=jnp.int32)

    ref = cosface_reference(x, weight, label, s=s_val, m=m_val)

    # Exact-path check (f32 MXU feed), explicit small tiles to exercise the
    # full (B, C) grid + C padding + x_n caching.
    out_f32 = cosface_forward(x, weight, label, s=s_val, m=m_val,
                              tile_b=16, tile_c=256,
                              matmul_dtype=jnp.float32)
    out_f32 = jax.block_until_ready(out_f32)
    np.testing.assert_allclose(np.asarray(out_f32), np.asarray(ref),
                               rtol=1e-4, atol=2e-3)

    # Production default (bf16 MXU feed, f32 accumulate, auto tiles).
    out_bf16 = cosface_forward(x, weight, label, s=s_val, m=m_val)
    out_bf16 = jax.block_until_ready(out_bf16)
    np.testing.assert_allclose(np.asarray(out_bf16), np.asarray(ref),
                               rtol=0.0, atol=1.0)

    print("KERNEL_OK")
</pallas_src>

<mosaic_0001>
module attributes {stable_mosaic.version = 11 : i64} {
  func.func @_cosface_kernel(%arg0: i32, %arg1: i32, %arg2: memref<16x160xf32, #tpu.memory_space<vmem>>, %arg3: memref<256x160xf32, #tpu.memory_space<vmem>>, %arg4: memref<16x1xi32, #tpu.memory_space<vmem>>, %arg5: memref<16x256xf32, #tpu.memory_space<vmem>>, %arg6: memref<16x160xf32, #tpu.memory_space<vmem>>) attributes {dimension_semantics = [#tpu.dimension_semantics<parallel>, #tpu.dimension_semantics<arbitrary>], iteration_bounds = array<i64: 2, 3>, scalar_prefetch = 0 : i64, scratch_operands = 1 : i64, tpu.core_type = #tpu.core_type<tc>, window_params = [{transform_indices = @transform_0, window_bounds = array<i64: 16, 160>}, {transform_indices = @transform_1, window_bounds = array<i64: 256, 160>}, {transform_indices = @transform_2, window_bounds = array<i64: 16, 1>}, {transform_indices = @transform_3, window_bounds = array<i64: 16, 256>}]} {
    %c0_i32 = arith.constant 0 : i32
    %0 = arith.cmpi eq, %arg1, %c0_i32 : i32
    %1 = arith.extui %0 : i1 to i32
    %cst = arith.constant 1.000000e-24 : f32
    %c0_i32_0 = arith.constant 0 : i32
    %2 = arith.cmpi ne, %1, %c0_i32_0 : i32
    scf.if %2 {
      %c0_14 = arith.constant 0 : index
      %c0_15 = arith.constant 0 : index
      %28 = vector.load %arg2[%c0_14, %c0_15] : memref<16x160xf32, #tpu.memory_space<vmem>>, vector<16x160xf32>
      %29 = arith.mulf %28, %28 : vector<16x160xf32>
      %cst_16 = arith.constant dense<0.000000e+00> : vector<16xf32>
      %30 = vector.multi_reduction <add>, %29, %cst_16 [1] : vector<16x160xf32> to vector<16xf32>
      %31 = vector.shape_cast %30 : vector<16xf32> to vector<16x1xf32>
      %32 = vector.broadcast %cst : f32 to vector<16x1xf32>
      %33 = arith.maximumf %31, %32 : vector<16x1xf32>
      %34 = math.rsqrt %33 : vector<16x1xf32>
      %35 = vector.broadcast %34 : vector<16x1xf32> to vector<16x160xf32>
      %36 = arith.mulf %28, %35 : vector<16x160xf32>
      %c0_17 = arith.constant 0 : index
      %c0_18 = arith.constant 0 : index
      %37 = vector.load %arg6[%c0_17, %c0_18] : memref<16x160xf32, #tpu.memory_space<vmem>>, vector<16x160xf32>
      tpu.vector_store %arg6[%c0_17, %c0_18], %36 {strides = array<i32>} : memref<16x160xf32, #tpu.memory_space<vmem>>, vector<16x160xf32>,
    } else {
    }
    %c0 = arith.constant 0 : index
    %c0_1 = arith.constant 0 : index
    %3 = vector.load %arg3[%c0, %c0_1] : memref<256x160xf32, #tpu.memory_space<vmem>>, vector<256x160xf32>
    %4 = arith.mulf %3, %3 : vector<256x160xf32>
    %cst_2 = arith.constant dense<0.000000e+00> : vector<256xf32>
    %5 = vector.multi_reduction <add>, %4, %cst_2 [1] : vector<256x160xf32> to vector<256xf32>
    %6 = vector.shape_cast %5 : vector<256xf32> to vector<256x1xf32>
    %cst_3 = arith.constant 1.000000e-24 : f32
    %7 = vector.broadcast %cst_3 : f32 to vector<256x1xf32>
    %8 = arith.maximumf %6, %7 : vector<256x1xf32>
    %9 = math.rsqrt %8 : vector<256x1xf32>
    %10 = vector.broadcast %9 : vector<256x1xf32> to vector<256x160xf32>
    %11 = arith.mulf %3, %10 : vector<256x160xf32>
    %c0_4 = arith.constant 0 : index
    %c0_5 = arith.constant 0 : index
    %12 = vector.load %arg6[%c0_4, %c0_5] : memref<16x160xf32, #tpu.memory_space<vmem>>, vector<16x160xf32>
    %cst_6 = arith.constant dense<0.000000e+00> : vector<16x256xf32>
    %13 = tpu.matmul %12, %11, %cst_6 {dimension_numbers = #tpu.dot_dimension_numbers<[1], [1], [0], [0], [0, 0, 1, 0], [], []>} : vector<16x160xf32>, vector<256x160xf32>, vector<16x256xf32> -> vector<16x256xf32>
    %14 = tpu.iota {dimensions = array<i32: 1>} : vector<16x256xi32>
    %c256_i32 = arith.constant 256 : i32
    %15 = arith.muli %arg1, %c256_i32 : i32
    %16 = vector.broadcast %15 : i32 to vector<16x256xi32>
    %17 = arith.addi %14, %16 : vector<16x256xi32>
    %c0_7 = arith.constant 0 : index
    %c0_8 = arith.constant 0 : index
    %18 = vector.load %arg4[%c0_7, %c0_8] : memref<16x1xi32, #tpu.memory_space<vmem>>, vector<16x1xi32>
    %19 = vector.broadcast %18 : vector<16x1xi32> to vector<16x256xi32>
    %20 = arith.cmpi eq, %17, %19 : vector<16x256xi32>
    %cst_9 = arith.constant 6.400000e+01 : f32
    %21 = vector.broadcast %cst_9 : f32 to vector<16x256xf32>
    %22 = arith.mulf %13, %21 : vector<16x256xf32>
    %cst_10 = arith.constant 2.560000e+01 : f32
    %cst_11 = arith.constant 0.000000e+00 : f32
    %23 = vector.broadcast %cst_10 : f32 to vector<16x256xf32>
    %24 = vector.broadcast %cst_11 : f32 to vector<16x256xf32>
    %25 = arith.select %20, %23, %24 : vector<16x256xi1>, vector<16x256xf32>
    %26 = arith.subf %22, %25 : vector<16x256xf32>
    %c0_12 = arith.constant 0 : index
    %c0_13 = arith.constant 0 : index
    %27 = vector.load %arg5[%c0_12, %c0_13] : memref<16x256xf32, #tpu.memory_space<vmem>>, vector<16x256xf32>
    tpu.vector_store %arg5[%c0_12, %c0_13], %26 {strides = array<i32>} : memref<16x256xf32, #tpu.memory_space<vmem>>, vector<16x256xf32>,
    return
  }
  func.func @transform_0(%arg0: i32, %arg1: i32) -> (i32, i32) {
    %c0_i32 = arith.constant 0 : i32
    %c0_i32_0 = arith.constant 0 : i32
    return %arg0, %c0_i32 : i32, i32
  }
  func.func @transform_1(%arg0: i32, %arg1: i32) -> (i32, i32) {
    %c0_i32 = arith.constant 0 : i32
    %c0_i32_0 = arith.constant 0 : i32
    return %arg1, %c0_i32 : i32, i32
  }
  func.func @transform_2(%arg0: i32, %arg1: i32) -> (i32, i32) {
    %c0_i32 = arith.constant 0 : i32
    %c0_i32_0 = arith.constant 0 : i32
    return %arg0, %c0_i32 : i32, i32
  }
  func.func @transform_3(%arg0: i32, %arg1: i32) -> (i32, i32) {
    %c0_i32 = arith.constant 0 : i32
    return %arg0, %arg1 : i32, i32
  }
}

</mosaic_0001>

<bundles_post_ra>
// kernel: tpu_custom_call.1
= control target key start
LH: loop header
LB: loop body
LE: loop exit
PB: predicated region body
PF: predicated region fallthrough
CT: control target
= control target key end

     0   :  { %8 = vsyncpa [#allocation4], 0  ;;  %s2085_s0 = inlined_call_operand.vmem [shape: f32[32,160], index: 0, kind: input, shape index: {}]   ;;  %s2086_s1 = inlined_call_operand.vmem [shape: f32[768,160], index: 1, kind: input, shape index: {}]   ;;  %s2087_s2 = inlined_call_operand.vmem [shape: s32[32,1], index: 2, kind: input, shape index: {}]   ;;  %s2088_s3 = inlined_call_operand.hbm [shape: f32[32,768], index: 3, kind: output, shape index: {}]  }
   0x1   :  { %10 = vsyncpa [#allocation4 + $0x1], 0  ;;  %s1430_s12 = smov 0   ;;  %s1432_s13 = smov 0  }
   0x2   :  { %s1434_s14 = smov 0   ;;  %s1436_s15 = smov 0  }
   0x3   :  { %s1438_s16 = smov 0   ;;  %s1440_s17 = smov 0  }
   0x4   :  { %s1442_s18 = smov 0   ;;  %s1444_s19 = smov 0  }
   0x5 LB: > { %s990_s20 = sadd.s32 4294967295, %s1402_s19   ;;  %s991_s21 = sadd.s32 4294967294, %s1402_s19   ;;  %s1402_s19 = sphi %s1444_s19, %s16_s19   ;;  %s1398_s18 = sphi %s1442_s18, %s2161_s18   ;;  %s1394_s17 = sphi %s1440_s17, %s2160_s17   ;;  %s1390_s16 = sphi %s1438_s16, %s2159_s16   ;;  %s1386_s15 = sphi %s1436_s15, %s2158_s15   ;;  %s1382_s14 = sphi %s1434_s14, %s2157_s14   ;;  %s1378_s13 = sphi %s1432_s13, %s2156_s13   ;;  %s1374_s12 = sphi %s1430_s12, %s2155_s12  }
   0x6   : > { %s25_s22 = sadd.s32 1, %s1394_s17  ;;  %s28_s23 = sadd.s32 1, %s1398_s18 }
   0x7   : > { %p26_p0 = scmp.ge.s32.totalorder %s25_s22, 3  ;;  %p125_p1 = scmp.ne.s32.totalorder %s1382_s14, %s1378_s13 }
   0x8   : > { %p126_p2 = scmp.eq.s32.totalorder %s990_s20, 5  ;;  %p131_p5 = scmp.ne.s32.totalorder %s1378_s13, %s1374_s12 }
   0x9   : > { %s2163_s22 = smov (%p26_p0, %s25_s22), 0  ;;  %s2165_s23 = smov (!%p26_p0, %s28_s23), %s1398_s18 }
   0xa   : > { %2110 = sst [smem:[#allocation6_spill]] %s2163_s22  ;;  %s111_s24 = ssub.s32 %s1394_s17, %s2163_s22 }
   0xb   : > { %p1481_p3 = por %p126_p2, %p125_p1  ;;  %p30_p4 = scmp.ge.s32.totalorder %s2165_s23, 2 }
   0xc   : > { %p132_p6 = scmp.eq.s32.totalorder %s991_s21, 5  ;;  %p994_p7 = scmp.ge.s32.totalorder %s1402_s19, 1 }
   0xd   : > { %s2167_s23 = smov (%p30_p4, %s2165_s23), 0  ;;  %p179_p9 = scmp.lt.s32.totalorder %s1402_s19, 7 }
   0xe   : > { %2112 = sst [smem:[#allocation7_spill]] %s2167_s23  ;;  %p1490_p8 = por %p132_p6, %p131_p5 }
   0xf   : > { %s110_s27 = ssub.s32 %s1398_s18, %s2167_s23  ;;  %s115_s28 = sadd.s32 1, %s1382_s14 }
  0x10   : > { %s112_s29 = sor.u32 %s111_s24, %s110_s27  ;;  %p180_p10 = pnand %p994_p7, %p179_p9 }
  0x11   : > { %p113_p11 = scmp.eq.s32.totalorder %s112_s29, 0 }
  0x12   : > { %183 = sbr.rel (%p180_p10) target bundleno = 730 (0x2da), region = 32 }
  0x13   : > { %s1499_s30 = scalar_select %p113_p11, %s1382_s14, %s115_s28  }
  0x19   : > { %s2090_s4 = sand.u32 1, %s1378_s13   ;;  %s996_s5 = sshll.u32 %s1390_s16, 1 }
  0x1a   : > { %s995_s6 = sshll.u32 %s2090_s4, 5  ;;  %p216_p12 = scmp.lt.s32.totalorder %s996_s5, 3 }
  0x1b   : > { %s999_s7 = sshll.u32 %s1386_s15, 5  ;;  %s1519_s22 = scalar_lea.vmem [#allocation3], %s995_s6 }
  0x1c   : > { %s2169_s5 = smov (!%p216_p12, %s996_s5), 3  ;;  %p223_p13 = scmp.lt.s32.totalorder %s999_s7, 95 }
  0x1d   : > { %s1047_s8 = sshll.u32 %s2169_s5, 4  ;;  %s1003_s9 = sshll.u32 %s2169_s5, 3 }
  0x1e   : > { %s220_s20 = scalar_lea.vmem %s2085_s0, %s1047_s8  ;;  %s1512_s27 = scalar_lea.vmem %s2087_s2, %s1003_s9 }
  0x1f   : > { %s2171_s7 = smov (!%p223_p13, %s999_s7), 95  ;;  %p1004_p0 = scmp.ne.s32.totalorder %s1386_s15, 0 }
  0x20   : > { %s1048_s28 = sshll.u32 %s2171_s7, 4  ;;  %v241_v0 = vld [vmem:[%s220_s20] sm:$0xff] (!%p1004_p0)  ;;  %v242_v1 = vld [vmem:[%s220_s20 + $0x8] sm:$0xff] (!%p1004_p0)  ;;  %vm249_vm0 = vcmask (!%p1004_p0), 261120   ;;  %v243_v2 = vld [vmem:[%s220_s20 + $0x10] sm:$0xff] (!%p1004_p0) }
  0x21   : > { %s1517_s4 = scalar_lea.vmem %s2086_s1, %s1048_s28  ;;  %240 = sbr.rel (%p1004_p0) target bundleno = 200 (0xc8), region = 36  ;;  %v245_v3 = vmul.f32 (!%p1004_p0), %v241_v0, %v241_v0  ;;  %v246_v4 = vmul.f32 (!%p1004_p0), %v242_v1, %v242_v1  ;;  %v244_v5 = vld [vmem:[%s220_s20 + $0x18] sm:$0xff] (!%p1004_p0)  ;;  %v247_v6 = vmul.f32 (!%p1004_p0), %v243_v2, %v243_v2 }
  0x22   : > { %v248_v7 = vmul.f32 (!%p1004_p0), %v244_v5, %v244_v5 }
  0x23   : > { %v250_v8 = vsel (!%p1004_p0), %vm249_vm0, %v246_v4, 0.0 }
  0x24   : > { %v251_v9 = vadd.f32 (!%p1004_p0), %v250_v8, %v245_v3  ;;  %v254_v10 = vsel (!%p1004_p0), %vm249_vm0, %v248_v7, 0.0 }
  0x25   : > { %v255_v11 = vadd.f32 (!%p1004_p0), %v254_v10, %v247_v6 }
  0x26   : > { %252 = vadd.xlane.f32.xlu0 (!%p1004_p0), %v251_v9 }
  0x2a   : > { %256 = vadd.xlane.f32.xlu0 %v255_v11 }
  0xb3   : > { %v253_v12 = vpop.xlane.xlu0 %252 }
  0xb4   : > { %v258_v13 = vmax.f32 %v253_v12, 1e-24 }
  0xb6   : > { %1238 = vrsqrt.f32 %v258_v13 }
  0xb7   : > { %v257_v14 = vpop.xlane.xlu0 %256 }
  0xb8   : > { %v259_v15 = vmax.f32 %v257_v14, 1e-24 }
  0xba   : > { %1240 = vrsqrt.f32 %v259_v15 }
  0xc0   : > { %v1239_v16 = vpop.eup %1238 }
  0xc1   : > { %v262_v17 = vmul.f32 %v1239_v16, %v241_v0  ;;  %v263_v18 = vmul.f32 %v1239_v16, %v242_v1 }
  0xc3   : > { %266 = vst [vmem:[#allocation2] sm:$0xff] %v262_v17  ;;  %267 = vst.msk [vmem:[#allocation2 + $0x8] sm:$0xff] %vm249_vm0, %v263_v18 }
  0xc4   : > { %v1241_v19 = vpop.eup %1240 }
  0xc5   : > { %v264_v20 = vmul.f32 %v1241_v19, %v243_v2  ;;  %v265_v21 = vmul.f32 %v1241_v19, %v244_v5 }
  0xc7   : > { %268 = vst [vmem:[#allocation2 + $0x10] sm:$0xff] %v264_v20  ;;  %269 = vst.msk [vmem:[#allocation2 + $0x18] sm:$0xff] %vm249_vm0, %v265_v21 }
  0xc8 PF: > { %v1527_v22 = vld [vmem:[%s1517_s4] sm:$0xff]  ;;  %v1530_v23 = vld [vmem:[%s1517_s4 + $0x8] sm:$0xff]  ;;  %vm398_vm1 = vcmask 261120   ;;  %v1545_v29 = vld [vmem:[%s1517_s4 + $0x10] sm:$0xff]  ;;  %s1039_s23 = sshll.u32 %s1386_s15, 8  ;;  %s1042_s5 = sshll.u32 %s1386_s15, 1 }
  0xc9   : > { %v1533_v24 = vld [vmem:[%s1517_s4 + $0x20] sm:$0xff]  ;;  %v334_v25 = vmul.f32 %v1527_v22, %v1527_v22  ;;  %v335_v26 = vmul.f32 %v1530_v23, %v1530_v23  ;;  %v1540_v27 = vld [vmem:[%s1517_s4 + $0x28] sm:$0xff]  ;;  %v1548_v30 = vld [vmem:[%s1517_s4 + $0x18] sm:$0xff]  ;;  %v336_v32 = vmul.f32 %v1545_v29, %v1545_v29  ;;  %s890_s8 = sshll.u32 %s1519_s22, 4  ;;  %s2152_s10 = sand.u32 1, %s1378_s13   ;;  %s2025_s8 = int_to_ptr.vmem [resolvable:$true] %s890_s8 }
  0xca   : > { %v338_v28 = vmul.f32 %v1533_v24, %v1533_v24  ;;  %v339_v31 = vmul.f32 %v1540_v27, %v1540_v27  ;;  %v337_v33 = vmul.f32 %v1548_v30, %v1548_v30  ;;  %v1557_v34 = vld [vmem:[%s1517_s4 + $0x30] sm:$0xff]  ;;  %v1560_v35 = vld [vmem:[%s1517_s4 + $0x38] sm:$0xff]  ;;  %v1571_v40 = vld [vmem:[%s1517_s4 + $0x40] sm:$0xff]  ;;  %s2033_s11 = scalar_lea.sflag [#allocation4], %s2152_s10  ;;  %s1308_s20 = scalar_lea.vmem %s2025_s8, 512 }
  0xcb   : > { %v399_v36 = vsel %vm398_vm1, %v335_v26, 0.0  ;;  %v340_v37 = vmul.f32 %v1557_v34, %v1557_v34  ;;  %v341_v38 = vmul.f32 %v1560_v35, %v1560_v35  ;;  %v1568_v39 = vld [vmem:[%s1517_s4 + $0x58] sm:$0xff]  ;;  %v1574_v41 = vld [vmem:[%s1517_s4 + $0x48] sm:$0xff]  ;;  %v1579_v45 = vld [vmem:[%s1517_s4 + $0x50] sm:$0xff]  ;;  %v342_v52 = vmul.f32 %v1571_v40, %v1571_v40  ;;  %p1309_p1 = scmp.ne.s32.totalorder %s2025_s8, %s1308_s20  ;;  %s1406_s21 = smov [#allocation3]  }
  0xcc   : > { %v400_v42 = vadd.f32 %v399_v36, %v334_v25  ;;  %v407_v43 = vsel %vm398_vm1, %v339_v31, 0.0  ;;  %v403_v44 = vsel %vm398_vm1, %v337_v33, 0.0  ;;  %v345_v46 = vmul.f32 %v1568_v39, %v1568_v39  ;;  %v1585_v49 = vld [vmem:[%s1517_s4 + $0x78] sm:$0xff]  ;;  %v1588_v50 = vld [vmem:[%s1517_s4 + $0x68] sm:$0xff]  ;;  %v1597_v56 = vld [vmem:[%s1517_s4 + $0x60] sm:$0xff]  ;;  %s1312_s24 = sshll.u32 %s1406_s21, 4  ;;  %s1313_s24 = int_to_ptr.vmem [resolvable:$false] %s1312_s24 }
  0xcd   : > { %v408_v47 = vadd.f32 %v407_v43, %v338_v28  ;;  %v411_v48 = vsel %vm398_vm1, %v341_v38, 0.0  ;;  %v404_v51 = vadd.f32 %v403_v44, %v336_v32  ;;  %v343_v53 = vmul.f32 %v1574_v41, %v1574_v41  ;;  %v1604_v60 = vld [vmem:[%s1517_s4 + $0x70] sm:$0xff]  ;;  %v1609_v62 = vld [vmem:[%s1517_s4 + $0x88] sm:$0xff]  ;;  %v1612_v63 = vld [vmem:[%s1517_s4 + $0x98] sm:$0xff]  ;;  %p1310_p2 = pnand %p1309_p1, %p1481_p3  ;;  %p1315_p5 = scmp.lt.s32.totalorder %s2025_s8, %s1313_s24 }
  0xce   : > { %401 = vadd.xlane.f32.xlu0 %v400_v42  ;;  %v412_v54 = vadd.f32 %v411_v48, %v340_v37  ;;  %v344_v55 = vmul.f32 %v1579_v45, %v1579_v45  ;;  %v347_v57 = vmul.f32 %v1588_v50, %v1588_v50  ;;  %v419_v58 = vsel %vm398_vm1, %v345_v46, 0.0  ;;  %v1620_v5 = vld [vmem:[%s1517_s4 + $0x80] sm:$0xff]  ;;  %v1626_v8 = vld [vmem:[%s1517_s4 + $0x90] sm:$0xff]  ;;  %v1631_v10 = vld [vmem:[%s1517_s4 + $0xa8] sm:$0xff] }
  0xcf   : > { %409 = vadd.xlane.f32.xlu1 %v408_v47  ;;  %v415_v59 = vsel %vm398_vm1, %v343_v53, 0.0  ;;  %v349_v61 = vmul.f32 %v1585_v49, %v1585_v49  ;;  %v346_v1 = vmul.f32 %v1597_v56, %v1597_v56  ;;  %v348_v3 = vmul.f32 %v1604_v60, %v1604_v60  ;;  %v1634_v11 = vld [vmem:[%s1517_s4 + $0xb8] sm:$0xff]  ;;  %v1642_v17 = vld [vmem:[%s1517_s4 + $0xa0] sm:$0xff]  ;;  %v1648_v20 = vld [vmem:[%s1517_s4 + $0xb0] sm:$0xff]  ;;  %p1311_p4 = pneg %p1310_p2 }
  0xd0   : > { %v416_v0 = vadd.f32 %v415_v59, %v342_v52  ;;  %v420_v2 = vadd.f32 %v419_v58, %v344_v55  ;;  %v423_v4 = vsel %vm398_vm1, %v347_v57, 0.0  ;;  %v351_v6 = vmul.f32 %v1609_v62, %v1609_v62  ;;  %v1653_v25 = vld [vmem:[%s1517_s4 + $0xc8] sm:$0xff]  ;;  %v1656_v26 = vld [vmem:[%s1517_s4 + $0xd8] sm:$0xff]  ;;  %v1664_v37 = vld [vmem:[%s1517_s4 + $0xc0] sm:$0xff] }
  0xd1   : > { %v427_v7 = vsel %vm398_vm1, %v349_v61, 0.0  ;;  %v353_v9 = vmul.f32 %v1612_v63, %v1612_v63  ;;  %v424_v12 = vadd.f32 %v423_v4, %v346_v1  ;;  %v350_v13 = vmul.f32 %v1620_v5, %v1620_v5  ;;  %v1670_v43 = vld [vmem:[%s1517_s4 + $0xd0] sm:$0xff]  ;;  %v1675_v46 = vld [vmem:[%s1517_s4 + $0xe8] sm:$0xff]  ;;  %v1678_v47 = vld [vmem:[%s1517_s4 + $0xf8] sm:$0xff] }
  0xd2   : > { %405 = vadd.xlane.f32.xlu0 %v404_v51  ;;  %v428_v14 = vadd.f32 %v427_v7, %v348_v3  ;;  %v352_v15 = vmul.f32 %v1626_v8, %v1626_v8  ;;  %v431_v16 = vsel %vm398_vm1, %v351_v6, 0.0  ;;  %v355_v18 = vmul.f32 %v1631_v10, %v1631_v10  ;;  %v1686_v55 = vld [vmem:[%s1517_s4 + $0xe0] sm:$0xff]  ;;  %v1692_v59 = vld [vmem:[%s1517_s4 + $0xf0] sm:$0xff]  ;;  %v1700_v1 = vld [vmem:[%s1517_s4 + $0x118] sm:$0xff] }
  0xd3   : > { %413 = vadd.xlane.f32.xlu1 %v412_v54  ;;  %v435_v19 = vsel %vm398_vm1, %v353_v9, 0.0  ;;  %v357_v21 = vmul.f32 %v1634_v11, %v1634_v11  ;;  %v432_v28 = vadd.f32 %v431_v16, %v350_v13  ;;  %v354_v31 = vmul.f32 %v1642_v17, %v1642_v17  ;;  %v1708_v9 = vld [vmem:[%s1517_s4 + $0x100] sm:$0xff]  ;;  %v1719_v16 = vld [vmem:[%s1517_s4 + $0x128] sm:$0xff]  ;;  %vm1887_vm2 = vmpackc.low %vm398_vm1, %vm398_vm1 }
  0xd4   : > { %v436_v32 = vadd.f32 %v435_v19, %v352_v15  ;;  %v356_v33 = vmul.f32 %v1648_v20, %v1648_v20  ;;  %v439_v36 = vsel %vm398_vm1, %v355_v18, 0.0  ;;  %v359_v38 = vmul.f32 %v1653_v25, %v1653_v25  ;;  %v1722_v18 = vld [vmem:[%s1517_s4 + $0x138] sm:$0xff] }
  0xd5   : > { %v443_v42 = vsel %vm398_vm1, %v357_v21, 0.0  ;;  %v361_v44 = vmul.f32 %v1656_v26, %v1656_v26  ;;  %v440_v48 = vadd.f32 %v439_v36, %v354_v31  ;;  %v358_v51 = vmul.f32 %v1664_v37, %v1664_v37 }
  0xd6   : > { %417 = vadd.xlane.f32.xlu0 %v416_v0  ;;  %v444_v52 = vadd.f32 %v443_v42, %v356_v33  ;;  %v360_v53 = vmul.f32 %v1670_v43, %v1670_v43  ;;  %v447_v54 = vsel %vm398_vm1, %v359_v38, 0.0  ;;  %v363_v57 = vmul.f32 %v1675_v46, %v1675_v46  ;;  %v1697_v0 = vld [vmem:[%s1517_s4 + $0x108] sm:$0xff]  ;;  %v1730_v33 = vld [vmem:[%s1517_s4 + $0x120] sm:$0xff]  ;;  %v1736_v42 = vld [vmem:[%s1517_s4 + $0x130] sm:$0xff] }
  0xd7   : > { %421 = vadd.xlane.f32.xlu1 %v420_v2  ;;  %v451_v58 = vsel %vm398_vm1, %v361_v44, 0.0  ;;  %v365_v61 = vmul.f32 %v1678_v47, %v1678_v47  ;;  %v448_v2 = vadd.f32 %v447_v54, %v358_v51  ;;  %v362_v3 = vmul.f32 %v1686_v55, %v1686_v55  ;;  %v1744_v51 = vld [vmem:[%s1517_s4 + $0x158] sm:$0xff] }
  0xd8   : > { %v452_v4 = vadd.f32 %v451_v58, %v360_v53  ;;  %v364_v6 = vmul.f32 %v1692_v59, %v1692_v59  ;;  %v455_v7 = vsel %vm398_vm1, %v363_v57, 0.0  ;;  %v369_v15 = vmul.f32 %v1700_v1, %v1700_v1 }
  0xd9   : > { %v459_v13 = vsel %vm398_vm1, %v365_v61, 0.0  ;;  %v456_v19 = vadd.f32 %v455_v7, %v362_v3  ;;  %v366_v21 = vmul.f32 %v1708_v9, %v1708_v9  ;;  %v371_v36 = vmul.f32 %v1719_v16, %v1719_v16  ;;  %v1752_v61 = vld [vmem:[%s1517_s4 + $0x140] sm:$0xff]  ;;  %v1763_v7 = vld [vmem:[%s1517_s4 + $0x168] sm:$0xff] }
  0xda   : > { %425 = vadd.xlane.f32.xlu0 %v424_v12  ;;  %v367_v12 = vmul.f32 %v1697_v0, %v1697_v0  ;;  %v467_v38 = vsel %vm398_vm1, %v369_v15, 0.0  ;;  %v373_v44 = vmul.f32 %v1722_v18, %v1722_v18  ;;  %v370_v53 = vmul.f32 %v1730_v33, %v1730_v33  ;;  %2115 = vst [vmem:[#allocation9_spill] sm:$0xff] %v1763_v7 }
  0xdb   : > { %429 = vadd.xlane.f32.xlu1 %v428_v14  ;;  %v1714_v14 = vld [vmem:[%s1517_s4 + $0x110] sm:$0xff]  ;;  %v372_v57 = vmul.f32 %v1736_v42, %v1736_v42  ;;  %v471_v58 = vsel %vm398_vm1, %v371_v36, 0.0  ;;  %v374_v15 = vmul.f32 %v1752_v61, %v1752_v61 }
  0xdc   : > { %v368_v31 = vmul.f32 %v1714_v14, %v1714_v14  ;;  %v475_v3 = vsel %vm398_vm1, %v373_v44, 0.0 }
  0xde   : > { %433 = vadd.xlane.f32.xlu0 %v432_v28  ;;  %v460_v28 = vadd.f32 %v459_v13, %v364_v6  ;;  %v468_v54 = vadd.f32 %v467_v38, %v368_v31  ;;  %v377_v6 = vmul.f32 %v1744_v51, %v1744_v51  ;;  %v472_v13 = vadd.f32 %v471_v58, %v370_v53  ;;  %v1774_v31 = vld [vmem:[%s1517_s4 + $0x160] sm:$0xff]  ;;  %v1780_v38 = vld [vmem:[%s1517_s4 + $0x170] sm:$0xff]  ;;  %v1788_v53 = vld [vmem:[%s1517_s4 + $0x198] sm:$0xff] }
  0xdf   : > { %437 = vadd.xlane.f32.xlu1 %v436_v32  ;;  %v463_v32 = vsel %vm398_vm1, %v367_v12, 0.0  ;;  %v1766_v12 = vld [vmem:[%s1517_s4 + $0x178] sm:$0xff]  ;;  %2117 = vst [vmem:[#allocation11_spill] sm:$0xff] %v1774_v31  ;;  %2118 = vst [vmem:[#allocation12_spill] sm:$0xff] %v1780_v38 }
  0xe0   : > { %2116 = vst [vmem:[#allocation10_spill] sm:$0xff] %v1766_v12  ;;  %v483_v36 = vsel %vm398_vm1, %v377_v6, 0.0  ;;  %v381_v44 = vmul.f32 %v1766_v12, %v1766_v12  ;;  %2120 = vst [vmem:[#allocation14_spill] sm:$0xff] %v1788_v53  ;;  %v1796_v6 = vld [vmem:[%s1517_s4 + $0x180] sm:$0xff] }
  0xe1   : > { %2121 = vst [vmem:[#allocation15_spill] sm:$0xff] %v1796_v6 }
  0xe2   : > { %441 = vadd.xlane.f32.xlu0 %v440_v48  ;;  %v1741_v48 = vld [vmem:[%s1517_s4 + $0x148] sm:$0xff] }
  0xe3   : > { %445 = vadd.xlane.f32.xlu1 %v444_v52  ;;  %v464_v52 = vadd.f32 %v463_v32, %v366_v21  ;;  %v379_v32 = vmul.f32 %v1763_v7, %v1763_v7 }
  0xe6   : > { %449 = vadd.xlane.f32.xlu0 %v448_v2  ;;  %v375_v2 = vmul.f32 %v1741_v48, %v1741_v48 }
  0xe7   : > { %453 = vadd.xlane.f32.xlu1 %v452_v4  ;;  %v1758_v4 = vld [vmem:[%s1517_s4 + $0x150] sm:$0xff] }
  0xe8   : > { %2114 = vst [vmem:[#allocation8_spill] sm:$0xff] %v1758_v4  ;;  %v376_v21 = vmul.f32 %v1758_v4, %v1758_v4  ;;  %v1868_v4 = vld [vmem:[%s1517_s4 + $0x1f0] sm:$0xff] }
  0xe9   : > { %2131 = vst [vmem:[#allocation25_spill] sm:$0xff] %v1868_v4 }
  0xea   : > { %457 = vadd.xlane.f32.xlu0 %v456_v19  ;;  %v476_v19 = vadd.f32 %v475_v3, %v372_v57  ;;  %v378_v57 = vmul.f32 %v1774_v31, %v1774_v31  ;;  %v484_v58 = vadd.f32 %v483_v36, %v376_v21  ;;  %v487_v3 = vsel %vm398_vm1, %v379_v32, 0.0  ;;  %v1807_v21 = vld [vmem:[%s1517_s4 + $0x1a8] sm:$0xff]  ;;  %v1818_v31 = vld [vmem:[%s1517_s4 + $0x1a0] sm:$0xff] }
  0xeb   : > { %461 = vadd.xlane.f32.xlu1 %v460_v28  ;;  %v479_v28 = vsel %vm398_vm1, %v375_v2, 0.0  ;;  %v380_v2 = vmul.f32 %v1780_v38, %v1780_v38  ;;  %2123 = vst [vmem:[#allocation17_spill] sm:$0xff] %v1807_v21  ;;  %v382_v36 = vmul.f32 %v1796_v6, %v1796_v6  ;;  %2125 = vst [vmem:[#allocation19_spill] sm:$0xff] %v1818_v31  ;;  %v1840_v6 = vld [vmem:[%s1517_s4 + $0x1c0] sm:$0xff] }
  0xec   : > { %v488_v32 = vadd.f32 %v487_v3, %v378_v57  ;;  %v1824_v57 = vld [vmem:[%s1517_s4 + $0x1b0] sm:$0xff]  ;;  %v1832_v3 = vld [vmem:[%s1517_s4 + $0x1d8] sm:$0xff] }
  0xed   : > { %2126 = vst [vmem:[#allocation20_spill] sm:$0xff] %v1824_v57  ;;  %2128 = vst [vmem:[#allocation22_spill] sm:$0xff] %v1832_v3 }
  0xee   : > { %465 = vadd.xlane.f32.xlu0 %v464_v52  ;;  %v1785_v52 = vld [vmem:[%s1517_s4 + $0x188] sm:$0xff] }
  0xef   : > { %469 = vadd.xlane.f32.xlu1 %v468_v54  ;;  %2119 = vst [vmem:[#allocation13_spill] sm:$0xff] %v1785_v52  ;;  %v480_v54 = vadd.f32 %v479_v28, %v374_v15  ;;  %v383_v12 = vmul.f32 %v1785_v52, %v1785_v52  ;;  %v1802_v15 = vld [vmem:[%s1517_s4 + $0x190] sm:$0xff]  ;;  %v1810_v28 = vld [vmem:[%s1517_s4 + $0x1b8] sm:$0xff] }
  0xf0   : > { %2122 = vst [vmem:[#allocation16_spill] sm:$0xff] %v1802_v15  ;;  %2124 = vst [vmem:[#allocation18_spill] sm:$0xff] %v1810_v28 }
  0xf1   : > { %v495_v38 = vsel %vm398_vm1, %v383_v12, 0.0 }
  0xf2   : > { %473 = vadd.xlane.f32.xlu0 %v472_v13  ;;  %v491_v13 = vsel %vm398_vm1, %v381_v44, 0.0  ;;  %v384_v44 = vmul.f32 %v1802_v15, %v1802_v15  ;;  %v496_v12 = vadd.f32 %v495_v38, %v382_v36  ;;  %v1846_v38 = vld [vmem:[%s1517_s4 + $0x1d0] sm:$0xff]  ;;  %v1851_v36 = vld [vmem:[%s1517_s4 + $0x1e8] sm:$0xff] }
  0xf3   : > { %477 = vadd.xlane.f32.xlu1 %v476_v19  ;;  %v385_v19 = vmul.f32 %v1788_v53, %v1788_v53  ;;  %v492_v52 = vadd.f32 %v491_v13, %v380_v2  ;;  %v387_v53 = vmul.f32 %v1807_v21, %v1807_v21  ;;  %v1829_v2 = vld [vmem:[%s1517_s4 + $0x1c8] sm:$0xff]  ;;  %v386_v13 = vmul.f32 %v1818_v31, %v1818_v31  ;;  %v1862_v31 = vld [vmem:[%s1517_s4 + $0x1e0] sm:$0xff] }
  0xf4   : > { %2127 = vst [vmem:[#allocation21_spill] sm:$0xff] %v1829_v2  ;;  %2129 = vst [vmem:[#allocation23_spill] sm:$0xff] %v1851_v36 }
  0xf5   : > { %v503_v15 = vsel %vm398_vm1, %v387_v53, 0.0  ;;  %v390_v53 = vmul.f32 %v1840_v6, %v1840_v6 }
  0xf6   : > { %481 = vadd.xlane.f32.xlu0 %v480_v54  ;;  %v499_v54 = vsel %vm398_vm1, %v385_v19, 0.0  ;;  %v388_v19 = vmul.f32 %v1824_v57, %v1824_v57 }
  0xf7   : > { %485 = vadd.xlane.f32.xlu1 %v484_v58  ;;  %v389_v58 = vmul.f32 %v1810_v28, %v1810_v28  ;;  %v500_v21 = vadd.f32 %v499_v54, %v384_v44  ;;  %v391_v28 = vmul.f32 %v1829_v2, %v1829_v2  ;;  %v1854_v44 = vld [vmem:[%s1517_s4 + $0x1f8] sm:$0xff]  ;;  %v504_v54 = vadd.f32 %v503_v15, %v386_v13  ;;  %s1161_s4 = smul.u32 12, %s1390_s16 }
  0xf8   : > { %2130 = vst [vmem:[#allocation24_spill] sm:$0xff] %v1854_v44  ;;  %v392_v2 = vmul.f32 %v1846_v38, %v1846_v38  ;;  %v397_v15 = vmul.f32 %v1854_v44, %v1854_v44 }
  0xf9   : > { %s887_s6 = sadd.s32 %s1161_s4, %s1042_s5 }
  0xfa   : > { %489 = vadd.xlane.f32.xlu0 %v488_v32  ;;  %v507_v32 = vsel %vm398_vm1, %v389_v58, 0.0  ;;  %v511_v58 = vsel %vm398_vm1, %v391_v28, 0.0  ;;  %v396_v28 = vmul.f32 %v1868_v4, %v1868_v4  ;;  %s1044_s7 = sshll.u32 %s887_s6, 7 }
  0xfb   : > { %493 = vadd.xlane.f32.xlu1 %v492_v52  ;;  %v393_v52 = vmul.f32 %v1832_v3, %v1832_v3  ;;  %v508_v57 = vadd.f32 %v507_v32, %v388_v19  ;;  %v395_v3 = vmul.f32 %v1851_v36, %v1851_v36  ;;  %v523_v32 = vsel %vm398_vm1, %v397_v15, 0.0  ;;  %s2023_s9 = scalar_lea.hbm %s2088_s3, %s1044_s7 }
  0xfc   : > { %v524_v36 = vadd.f32 %v523_v32, %v396_v28 }
  0xfd   : > { %v515_v7 = vsel %vm398_vm1, %v393_v52, 0.0  ;;  %v519_v19 = vsel %vm398_vm1, %v395_v3, 0.0 }
  0xfe   : > { %497 = vadd.xlane.f32.xlu0 %v496_v12  ;;  %v394_v12 = vmul.f32 %v1862_v31, %v1862_v31  ;;  %v516_v13 = vadd.f32 %v515_v7, %v392_v2 }
  0xff   : > { %501 = vadd.xlane.f32.xlu1 %v500_v21  ;;  %v512_v21 = vadd.f32 %v511_v58, %v390_v53 }
 0x100   : > { %v520_v52 = vadd.f32 %v519_v19, %v394_v12 }
 0x102   : > { %505 = vadd.xlane.f32.xlu0 %v504_v54 }
 0x103   : > { %509 = vadd.xlane.f32.xlu1 %v508_v57 }
 0x106   : > { %513 = vadd.xlane.f32.xlu0 %v512_v21 }
 0x107   : > { %517 = vadd.xlane.f32.xlu1 %v516_v13 }
 0x10a   : > { %521 = vadd.xlane.f32.xlu0 %v520_v52 }
 0x10b   : > { %525 = vadd.xlane.f32.xlu1 %v524_v36 }
 0x15b   : > { %v402_v54 = vpop.xlane.xlu0 %401 }
 0x15c   : > { %v527_v53 = vmax.f32 %v402_v54, 1e-24  ;;  %v410_v58 = vpop.xlane.xlu1 %409  ;;  %v656_v54 = vld [vmem:[#allocation2 + $0x8] sm:$0xff] }
 0x15d   : > { %v529_v44 = vmax.f32 %v410_v58, 1e-24  ;;  %1037 = vmatprep.mubr.msk.f32.mxu0 %vm398_vm1, %v656_v54 }
 0x15e   : > { %1244 = vrsqrt.f32 %v527_v53 }
 0x15f   : > { %1246 = vrsqrt.f32 %v529_v44  ;;  %v406_v7 = vpop.xlane.xlu0 %405  ;;  %v658_v44 = vld [vmem:[#allocation2 + $0x18] sm:$0xff] }
 0x160   : > { %v528_v57 = vmax.f32 %v406_v7, 1e-24  ;;  %v414_v2 = vpop.xlane.xlu1 %413  ;;  %1038 = vmatprep.mubr.msk.f32.mxu1 %vm398_vm1, %v658_v44 }
 0x161   : > { %v530_v4 = vmax.f32 %v414_v2, 1e-24 }
 0x162   : > { %1248 = vrsqrt.f32 %v528_v57 }
 0x163   : > { %1250 = vrsqrt.f32 %v530_v4  ;;  %v418_v3 = vpop.xlane.xlu0 %417 }
 0x164   : > { %v422_v15 = vpop.xlane.xlu1 %421  ;;  %v531_v21 = vmax.f32 %v418_v3, 1e-24 }
 0x165   : > { %v532_v12 = vmax.f32 %v422_v15, 1e-24 }
 0x166   : > { %1252 = vrsqrt.f32 %v531_v21 }
 0x167   : > { %1254 = vrsqrt.f32 %v532_v12  ;;  %v426_v13 = vpop.xlane.xlu0 %425 }
 0x168   : > { %v1245_v36 = vpop.eup %1244  ;;  %v430_v28 = vpop.xlane.xlu1 %429  ;;  %v533_v32 = vmax.f32 %v426_v13, 1e-24 }
 0x169   : > { %v1247_v19 = vpop.eup %1246  ;;  %v534_v52 = vmax.f32 %v430_v28, 1e-24  ;;  %v592_v4 = vmul.f32 %v1245_v36, %v1530_v23  ;;  %v591_v2 = vmul.f32 %v1245_v36, %v1527_v22 }
 0x16a   : > { %v596_v58 = vmul.f32 %v1247_v19, %v1540_v27  ;;  %1256 = vrsqrt.f32 %v533_v32  ;;  %v845_v32 = vld [vmem:[%s1512_s27] sm:$0xff]  ;;  %v595_v44 = vmul.f32 %v1247_v19, %v1533_v24 }
 0x16b   : > { %1258 = vrsqrt.f32 %v534_v52  ;;  %v434_v23 = vpop.xlane.xlu0 %433 }
 0x16c   : > { %v1249_v53 = vpop.eup %1248 }
 0x16d   : > { %v1251_v7 = vpop.eup %1250  ;;  %v594_v57 = vmul.f32 %v1249_v53, %v1548_v30  ;;  %v593_v3 = vmul.f32 %v1249_v53, %v1545_v29  ;;  %v438_v30 = vpop.xlane.xlu1 %437  ;;  %v535_v29 = vmax.f32 %v434_v23, 1e-24 }
 0x16e   : > { %v598_v21 = vmul.f32 %v1251_v7, %v1560_v35  ;;  %v536_v28 = vmax.f32 %v438_v30, 1e-24  ;;  %v846_v35 = vld [vmem:[%s1512_s27 + $0x8] sm:$0xff]  ;;  %v597_v53 = vmul.f32 %v1251_v7, %v1557_v34  ;;  %s1314_s27 = scalar_lea.vmem %s1313_s24, 1024 }
 0x16f   : > { %v1049_v27 = vpack.c.bf16 %v594_v57, %v592_v4  ;;  %v1052_v12 = vpack.c.bf16 %v593_v3, %v591_v2  ;;  %v1404_v4 = vmov 0   ;;  %1260 = vrsqrt.f32 %v535_v29  ;;  %p1316_p6 = scmp.lt.s32.totalorder %s1314_s27, %s1308_s20 }
 0x170   : > { %v1253_v13 = vpop.eup %1252  ;;  %v1054_v22 = vpack.c.bf16 %v598_v21, %v596_v58  ;;  %1243 = vset.pattern.permute.xlu1 %v1404_v4  ;;  %1242 = vset.pattern.permute.xlu0 %v1404_v4  ;;  %1262 = vrsqrt.f32 %v536_v28  ;;  %v442_v58 = vpop.xlane.xlu0 %441  ;;  %v1057_v23 = vpack.c.bf16 %v597_v53, %v595_v44 }
 0x171   : > { %v1255_v36 = vpop.eup %1254  ;;  %1051 = vmatprep.subr.msk.bf16.mxu0 %vm1887_vm2, %v1049_v27  ;;  %1129 = vmatprep.subr.msk.bf16.mxu1 %vm1887_vm2, %v1049_v27  ;;  %v600_v52 = vmul.f32 %v1253_v13, %v1574_v41  ;;  %v446_v3 = vpop.xlane.xlu1 %445  ;;  %v537_v41 = vmax.f32 %v442_v58, 1e-24  ;;  %v599_v24 = vmul.f32 %v1253_v13, %v1571_v40  ;;  %p1317_p7 = por %p1316_p6, %p1315_p5 }
 0x172   : > { %1053 = vmatpush1.bf16.xpose.msra.mxu0 %v1052_v12  ;;  %1145 = vmatpush1.bf16.xpose.msra.mxu1 %v1052_v12  ;;  %v602_v54 = vmul.f32 %v1255_v36, %v1568_v39  ;;  %v601_v34 = vmul.f32 %v1255_v36, %v1579_v45  ;;  %v538_v39 = vmax.f32 %v446_v3, 1e-24 }
 0x173   : > { %1056 = vmatprep.subr.msk.bf16.mxu0 %vm1887_vm2, %v1054_v22  ;;  %1130 = vmatprep.subr.msk.bf16.mxu1 %vm1887_vm2, %v1054_v22  ;;  %1264 = vrsqrt.f32 %v537_v41  ;;  %p1318_p9 = pnand %p1317_p7, %p1311_p4 }
 0x174   : > { %851 = vperm.xlu1 %1243, %v846_v35   ;;  %848 = vperm.xlu0 %1242, %v845_v32   ;;  %v1257_v57 = vpop.eup %1256  ;;  %v1059_v2 = vpack.c.bf16 %v602_v54, %v600_v52  ;;  %v1062_v27 = vpack.c.bf16 %v601_v34, %v599_v24  ;;  %1266 = vrsqrt.f32 %v538_v39  ;;  %v450_v12 = vpop.xlane.xlu0 %449 }
 0x175   : > { %v1259_v21 = vpop.eup %1258  ;;  %v604_v19 = vmul.f32 %v1257_v57, %v1588_v50  ;;  %v454_v40 = vpop.xlane.xlu1 %453  ;;  %v539_v45 = vmax.f32 %v450_v12, 1e-24  ;;  %v603_v36 = vmul.f32 %v1257_v57, %v1597_v56 }
 0x176   : > { %v606_v7 = vmul.f32 %v1259_v21, %v1585_v49  ;;  %v605_v29 = vmul.f32 %v1259_v21, %v1604_v60  ;;  %v540_v28 = vmax.f32 %v454_v40, 1e-24 }
 0x177   : > { %1268 = vrsqrt.f32 %v539_v45 }
 0x178   : > { %v1064_v22 = vpack.c.bf16 %v606_v7, %v604_v19  ;;  %v1067_v35 = vpack.c.bf16 %v605_v29, %v603_v36  ;;  %1270 = vrsqrt.f32 %v540_v28  ;;  %v458_v32 = vpop.xlane.xlu0 %457 }
 0x179   : > { %v1261_v30 = vpop.eup %1260  ;;  %v462_v56 = vpop.xlane.xlu1 %461  ;;  %v541_v60 = vmax.f32 %v458_v32, 1e-24 }
 0x17a   : > { %1058 = vmatpush1.bf16.xpose.msra.mxu0 %v1057_v23  ;;  %1146 = vmatpush1.bf16.xpose.msra.mxu1 %v1057_v23  ;;  %v1263_v13 = vpop.eup %1262  ;;  %v608_v49 = vmul.f32 %v1261_v30, %v1609_v62  ;;  %v607_v53 = vmul.f32 %v1261_v30, %v1620_v5  ;;  %v542_v58 = vmax.f32 %v462_v56, 1e-24 }
 0x17b   : > { %1061 = vmatprep.subr.msk.bf16.mxu0 %vm1887_vm2, %v1059_v2  ;;  %1131 = vmatprep.subr.msk.bf16.mxu1 %vm1887_vm2, %v1059_v2  ;;  %v610_v50 = vmul.f32 %v1263_v13, %v1612_v63  ;;  %v609_v4 = vmul.f32 %v1263_v13, %v1626_v8  ;;  %1272 = vrsqrt.f32 %v541_v60 }
 0x17c   : > { %1274 = vrsqrt.f32 %v542_v58  ;;  %v466_v2 = vpop.xlane.xlu0 %465 }
 0x17d   : > { %v1265_v52 = vpop.eup %1264  ;;  %v1069_v54 = vpack.c.bf16 %v610_v50, %v608_v49  ;;  %v1072_v57 = vpack.c.bf16 %v609_v4, %v607_v53  ;;  %v470_v5 = vpop.xlane.xlu1 %469  ;;  %v543_v8 = vmax.f32 %v466_v2, 1e-24 }
 0x17e   : > { %v1267_v44 = vpop.eup %1266  ;;  %v612_v62 = vmul.f32 %v1265_v52, %v1631_v10  ;;  %v611_v41 = vmul.f32 %v1265_v52, %v1642_v17  ;;  %v544_v34 = vmax.f32 %v470_v5, 1e-24 }
 0x17f   : > { %v614_v63 = vmul.f32 %v1267_v44, %v1634_v11  ;;  %v613_v24 = vmul.f32 %v1267_v44, %v1648_v20  ;;  %1276 = vrsqrt.f32 %v543_v8 }
 0x180   : > { %1278 = vrsqrt.f32 %v544_v34  ;;  %v474_v19 = vpop.xlane.xlu0 %473 }
 0x181   : > { %v1269_v3 = vpop.eup %1268  ;;  %v1074_v21 = vpack.c.bf16 %v614_v63, %v612_v62  ;;  %v1077_v39 = vpack.c.bf16 %v613_v24, %v611_v41  ;;  %v478_v17 = vpop.xlane.xlu1 %477  ;;  %v545_v20 = vmax.f32 %v474_v19, 1e-24 }
 0x182   : > { %1063 = vmatpush1.bf16.xpose.msra.mxu0 %v1062_v27  ;;  %1147 = vmatpush1.bf16.xpose.msra.mxu1 %v1062_v27  ;;  %v1271_v23 = vpop.eup %1270  ;;  %v616_v10 = vmul.f32 %v1269_v3, %v1653_v25  ;;  %v615_v30 = vmul.f32 %v1269_v3, %v1664_v37  ;;  %v546_v40 = vmax.f32 %v478_v17, 1e-24 }
 0x183   : > { %1066 = vmatprep.subr.msk.bf16.mxu0 %vm1887_vm2, %v1064_v22  ;;  %1132 = vmatprep.subr.msk.bf16.mxu1 %vm1887_vm2, %v1064_v22  ;;  %v618_v11 = vmul.f32 %v1271_v23, %v1656_v26  ;;  %v617_v22 = vmul.f32 %v1271_v23, %v1670_v43  ;;  %1280 = vrsqrt.f32 %v545_v20 }
 0x184   : > { %1282 = vrsqrt.f32 %v546_v40  ;;  %v482_v45 = vpop.xlane.xlu0 %481 }
 0x185   : > { %v1273_v7 = vpop.eup %1272  ;;  %v1079_v27 = vpack.c.bf16 %v618_v11, %v616_v10  ;;  %v1082_v13 = vpack.c.bf16 %v617_v22, %v615_v30  ;;  %v486_v37 = vpop.xlane.xlu1 %485  ;;  %v547_v43 = vmax.f32 %v482_v45, 1e-24  ;;  %v2134_v11 = vld [vmem:[#allocation8_spill] sm:$0xff] }
 0x186   : > { %v1275_v12 = vpop.eup %1274  ;;  %v620_v25 = vmul.f32 %v1273_v7, %v1675_v46  ;;  %v619_v49 = vmul.f32 %v1273_v7, %v1686_v55  ;;  %v2136_v7 = vld [vmem:[#allocation10_spill] sm:$0xff] }
 0x187   : > { %v622_v26 = vmul.f32 %v1275_v12, %v1678_v47  ;;  %v621_v50 = vmul.f32 %v1275_v12, %v1692_v59  ;;  %1284 = vrsqrt.f32 %v547_v43 }
 0x188   : > { %v490_v52 = vpop.xlane.xlu0 %489 }
 0x189   : > { %v1277_v36 = vpop.eup %1276  ;;  %v1084_v29 = vpack.c.bf16 %v622_v26, %v620_v25  ;;  %v1087_v32 = vpack.c.bf16 %v621_v50, %v619_v49  ;;  %v494_v55 = vpop.xlane.xlu1 %493  ;;  %v549_v59 = vmax.f32 %v490_v52, 1e-24  ;;  %v2137_v25 = vld [vmem:[#allocation11_spill] sm:$0xff] }
 0x18a   : > { %1068 = vmatpush1.bf16.xpose.msra.mxu0 %v1067_v35  ;;  %1148 = vmatpush1.bf16.xpose.msra.mxu1 %v1067_v35  ;;  %v1279_v28 = vpop.eup %1278  ;;  %v548_v35 = vmax.f32 %v486_v37, 1e-24  ;;  %v624_v46 = vmul.f32 %v1277_v36, %v1697_v0  ;;  %v623_v60 = vmul.f32 %v1277_v36, %v1708_v9  ;;  %v550_v4 = vmax.f32 %v494_v55, 1e-24  ;;  %v2142_v55 = vld [vmem:[#allocation16_spill] sm:$0xff] }
 0x18b   : > { %1071 = vmatprep.subr.msk.bf16.mxu0 %vm1887_vm2, %v1069_v54  ;;  %1133 = vmatprep.subr.msk.bf16.mxu1 %vm1887_vm2, %v1069_v54  ;;  %v626_v47 = vmul.f32 %v1279_v28, %v1700_v1  ;;  %v625_v53 = vmul.f32 %v1279_v28, %v1714_v14  ;;  %v2140_v28 = vld [vmem:[#allocation14_spill] sm:$0xff] }
 0x18c   : > { %1286 = vrsqrt.f32 %v548_v35  ;;  %v498_v62 = vpop.xlane.xlu0 %497 }
 0x18d   : > { %v1281_v54 = vpop.eup %1280  ;;  %v1089_v56 = vpack.c.bf16 %v626_v47, %v624_v46  ;;  %1288 = vrsqrt.f32 %v549_v59  ;;  %v1092_v58 = vpack.c.bf16 %v625_v53, %v623_v60  ;;  %v502_v9 = vpop.xlane.xlu1 %501  ;;  %v551_v14 = vmax.f32 %v498_v62, 1e-24  ;;  %v2143_v60 = vld [vmem:[#allocation17_spill] sm:$0xff] }
 0x18e   : > { %v1283_v44 = vpop.eup %1282  ;;  %v628_v0 = vmul.f32 %v1281_v54, %v1719_v16  ;;  %1290 = vrsqrt.f32 %v550_v4  ;;  %v627_v3 = vmul.f32 %v1281_v54, %v1730_v33  ;;  %v552_v5 = vmax.f32 %v502_v9, 1e-24  ;;  %v2141_v54 = vld [vmem:[#allocation15_spill] sm:$0xff]  ;;  %v2144_v4 = vld [vmem:[#allocation18_spill] sm:$0xff] }
 0x18f   : > { %v630_v1 = vmul.f32 %v1283_v44, %v1722_v18  ;;  %1292 = vrsqrt.f32 %v551_v14 }
 0x190   : > { %1294 = vrsqrt.f32 %v552_v5  ;;  %v506_v8 = vpop.xlane.xlu0 %505  ;;  %v2148_v5 = vld [vmem:[#allocation22_spill] sm:$0xff] }
 0x191   : > { %v1285_v63 = vpop.eup %1284  ;;  %v510_v33 = vpop.xlane.xlu1 %509 }
 0x192   : > { %1073 = vmatpush1.bf16.xpose.msra.mxu0 %v1072_v57  ;;  %1149 = vmatpush1.bf16.xpose.msra.mxu1 %v1072_v57  ;;  %v1094_v57 = vpack.c.bf16 %v630_v1, %v628_v0  ;;  %v632_v16 = vmul.f32 %v1285_v63, %v1741_v48  ;;  %v631_v10 = vmul.f32 %v1285_v63, %v1752_v61  ;;  %v554_v19 = vmax.f32 %v510_v33, 1e-24  ;;  %v2135_v48 = vld [vmem:[#allocation9_spill] sm:$0xff] }
 0x193   : > { %1076 = vmatprep.subr.msk.bf16.mxu0 %vm1887_vm2, %v1074_v21  ;;  %1134 = vmatprep.subr.msk.bf16.mxu1 %vm1887_vm2, %v1074_v21  ;;  %v629_v21 = vmul.f32 %v1283_v44, %v1736_v42  ;;  %v553_v42 = vmax.f32 %v506_v8, 1e-24 }
 0x194   : > { %v514_v12 = vpop.xlane.xlu0 %513 }
 0x195   : > { %v1097_v23 = vpack.c.bf16 %v629_v21, %v627_v3  ;;  %1296 = vrsqrt.f32 %v553_v42  ;;  %v518_v61 = vpop.xlane.xlu1 %517  ;;  %v555_v40 = vmax.f32 %v514_v12, 1e-24  ;;  %v2147_v3 = vld [vmem:[#allocation21_spill] sm:$0xff] }
 0x196   : > { %v1287_v2 = vpop.eup %1286  ;;  %1298 = vrsqrt.f32 %v554_v19  ;;  %v556_v36 = vmax.f32 %v518_v61, 1e-24 }
 0x197   : > { %v634_v18 = vmul.f32 %v1287_v2, %v1744_v51  ;;  %v1289_v41 = vpop.eup %1288  ;;  %1300 = vrsqrt.f32 %v555_v40  ;;  %v1405_v40 = vmov 0.0  }
 0x198   : > { %v1291_v34 = vpop.eup %1290  ;;  %v636_v51 = vmul.f32 %v1289_v41, %v2135_v48  ;;  %v635_v26 = vmul.f32 %v1289_v41, %v2137_v25  ;;  %1302 = vrsqrt.f32 %v556_v36  ;;  %v522_v50 = vpop.xlane.xlu0 %521 }
 0x199   : > { %v1099_v24 = vpack.c.bf16 %v634_v18, %v632_v16  ;;  %v1293_v20 = vpop.eup %1292  ;;  %v526_v47 = vpop.xlane.xlu1 %525  ;;  %v557_v52 = vmax.f32 %v522_v50, 1e-24 }
 0x19a   : > { %1078 = vmatpush1.bf16.xpose.msra.mxu0 %v1077_v39  ;;  %1150 = vmatpush1.bf16.xpose.msra.mxu1 %v1077_v39  ;;  %v633_v39 = vmul.f32 %v1287_v2, %v2134_v11  ;;  %v1295_v22 = vpop.eup %1294  ;;  %v558_v59 = vmax.f32 %v526_v47, 1e-24  ;;  %v2146_v2 = vld [vmem:[#allocation20_spill] sm:$0xff] }
 0x19b   : > { %1081 = vmatprep.subr.msk.bf16.mxu0 %vm1887_vm2, %v1079_v27  ;;  %1135 = vmatprep.subr.msk.bf16.mxu1 %vm1887_vm2, %v1079_v27  ;;  %v638_v27 = vmul.f32 %v1291_v34, %v2136_v7  ;;  %v642_v43 = vmul.f32 %v1295_v22, %v2140_v28  ;;  %v641_v44 = vmul.f32 %v1295_v22, %v2142_v55  ;;  %1304 = vrsqrt.f32 %v557_v52  ;;  %v655_v7 = vld [vmem:[#allocation2] sm:$0xff] }
 0x19c   : > { %v1102_v17 = vpack.c.bf16 %v633_v39, %v631_v10  ;;  %1306 = vrsqrt.f32 %v558_v59  ;;  %v2150_v10 = vld [vmem:[#allocation24_spill] sm:$0xff] }
 0x19d   : > { %v1104_v30 = vpack.c.bf16 %v638_v27, %v636_v51  ;;  %v657_v27 = vld [vmem:[#allocation2 + $0x10] sm:$0xff] }
 0x19f   : > { %v1297_v35 = vpop.eup %1296 }
 0x1a0   : > { %v644_v53 = vmul.f32 %v1297_v35, %v2143_v60 }
 0x1a2   : > { %1083 = vmatpush1.bf16.xpose.msra.mxu0 %v1082_v13  ;;  %1151 = vmatpush1.bf16.xpose.msra.mxu1 %v1082_v13  ;;  %v2138_v13 = vld [vmem:[#allocation12_spill] sm:$0xff] }
 0x1a3   : > { %1086 = vmatprep.subr.msk.bf16.mxu0 %vm1887_vm2, %v1084_v29  ;;  %1136 = vmatprep.subr.msk.bf16.mxu1 %vm1887_vm2, %v1084_v29  ;;  %v637_v45 = vmul.f32 %v1291_v34, %v2138_v13  ;;  %v2139_v29 = vld [vmem:[#allocation13_spill] sm:$0xff]  ;;  %v2149_v34 = vld [vmem:[#allocation23_spill] sm:$0xff] }
 0x1a4   : > { %v640_v37 = vmul.f32 %v1293_v20, %v2139_v29 }
 0x1a5   : > { %v1107_v49 = vpack.c.bf16 %v637_v45, %v635_v26 }
 0x1a6   : > { %v1109_v46 = vpack.c.bf16 %v642_v43, %v640_v37 }
 0x1aa   : > { %1088 = vmatpush1.bf16.xpose.msra.mxu0 %v1087_v32  ;;  %1152 = vmatpush1.bf16.xpose.msra.mxu1 %v1087_v32  ;;  %v1299_v32 = vpop.eup %1298 }
 0x1ab   : > { %1091 = vmatprep.subr.msk.bf16.mxu0 %vm1887_vm2, %v1089_v56  ;;  %1137 = vmatprep.subr.msk.bf16.mxu1 %vm1887_vm2, %v1089_v56  ;;  %v639_v56 = vmul.f32 %v1293_v20, %v2141_v54  ;;  %v646_v0 = vmul.f32 %v1299_v32, %v2144_v4  ;;  %v645_v14 = vmul.f32 %v1299_v32, %v2146_v2  ;;  %v842_v20 = vstv %s1039_s23 }
 0x1ad   : > { %v1112_v1 = vpack.c.bf16 %v641_v44, %v639_v56  ;;  %v1114_v62 = vpack.c.bf16 %v646_v0, %v644_v53 }
 0x1b2   : > { %1093 = vmatpush1.bf16.xpose.msra.mxu0 %v1092_v58  ;;  %1153 = vmatpush1.bf16.xpose.msra.mxu1 %v1092_v58  ;;  %v1301_v58 = vpop.eup %1300 }
 0x1b3   : > { %1096 = vmatprep.subr.msk.bf16.mxu0 %vm1887_vm2, %v1094_v57  ;;  %1138 = vmatprep.subr.msk.bf16.mxu1 %vm1887_vm2, %v1094_v57  ;;  %v1303_v63 = vpop.eup %1302  ;;  %v2145_v57 = vld [vmem:[#allocation19_spill] sm:$0xff]  ;;  %v648_v21 = vmul.f32 %v1301_v58, %v2147_v3 }
 0x1b4   : > { %v643_v9 = vmul.f32 %v1297_v35, %v2145_v57  ;;  %v650_v16 = vmul.f32 %v1303_v63, %v2148_v5  ;;  %v649_v33 = vmul.f32 %v1303_v63, %v1846_v38 }
 0x1b6   : > { %v1117_v18 = vpack.c.bf16 %v645_v14, %v643_v9  ;;  %v1119_v8 = vpack.c.bf16 %v650_v16, %v648_v21 }
 0x1ba   : > { %1098 = vmatpush1.bf16.xpose.msra.mxu0 %v1097_v23  ;;  %1154 = vmatpush1.bf16.xpose.msra.mxu1 %v1097_v23  ;;  %v1305_v23 = vpop.eup %1304 }
 0x1bb   : > { %1101 = vmatprep.subr.msk.bf16.mxu0 %vm1887_vm2, %v1099_v24  ;;  %1139 = vmatprep.subr.msk.bf16.mxu1 %vm1887_vm2, %v1099_v24  ;;  %v1307_v41 = vpop.eup %1306  ;;  %v647_v24 = vmul.f32 %v1301_v58, %v1840_v6  ;;  %v652_v42 = vmul.f32 %v1305_v23, %v2149_v34  ;;  %v651_v48 = vmul.f32 %v1305_v23, %v1862_v31  ;;  %v2151_v6 = vld [vmem:[#allocation25_spill] sm:$0xff] }
 0x1bc   : > { %v654_v11 = vmul.f32 %v1307_v41, %v2150_v10  ;;  %v653_v51 = vmul.f32 %v1307_v41, %v2151_v6 }
 0x1bd   : > { %v1122_v39 = vpack.c.bf16 %v649_v33, %v647_v24 }
 0x1be   : > { %v1124_v19 = vpack.c.bf16 %v654_v11, %v652_v42  ;;  %v1127_v38 = vpack.c.bf16 %v653_v51, %v651_v48 }
 0x1c2   : > { %1103 = vmatpush1.bf16.xpose.msra.mxu0 %v1102_v17  ;;  %1155 = vmatpush1.bf16.xpose.msra.mxu1 %v1102_v17  ;;  %v838_v17 = vlaneseq }
 0x1c3   : > { %1106 = vmatprep.subr.msk.bf16.mxu0 %vm1887_vm2, %v1104_v30  ;;  %1140 = vmatprep.subr.msk.bf16.mxu1 %vm1887_vm2, %v1104_v30 }
 0x1c4   : > { %v839_v12 = vand.u32 127, %v838_v17 }
 0x1c6   : > { %v840_v31 = vadd.s32 128, %v839_v12  ;;  %v843_v30 = vadd.s32 %v842_v20, %v839_v12 }
 0x1c8   : > { %v844_v61 = vadd.s32 %v842_v20, %v840_v31 }
 0x1ca   : > { %1108 = vmatpush1.bf16.xpose.msra.mxu0 %v1107_v49  ;;  %1156 = vmatpush1.bf16.xpose.msra.mxu1 %v1107_v49 }
 0x1cb   : > { %1111 = vmatprep.subr.msk.bf16.mxu0 %vm1887_vm2, %v1109_v46  ;;  %1141 = vmatprep.subr.msk.bf16.mxu1 %vm1887_vm2, %v1109_v46 }
 0x1d2   : > { %1113 = vmatpush1.bf16.xpose.msra.mxu0 %v1112_v1  ;;  %1157 = vmatpush1.bf16.xpose.msra.mxu1 %v1112_v1 }
 0x1d3   : > { %1116 = vmatprep.subr.msk.bf16.mxu0 %vm1887_vm2, %v1114_v62  ;;  %1142 = vmatprep.subr.msk.bf16.mxu1 %vm1887_vm2, %v1114_v62 }
 0x1da   : > { %1118 = vmatpush1.bf16.xpose.msra.mxu0 %v1117_v18  ;;  %1158 = vmatpush1.bf16.xpose.msra.mxu1 %v1117_v18 }
 0x1db   : > { %1121 = vmatprep.subr.msk.bf16.mxu0 %vm1887_vm2, %v1119_v8  ;;  %1143 = vmatprep.subr.msk.bf16.mxu1 %vm1887_vm2, %v1119_v8 }
 0x1e2   : > { %1123 = vmatpush1.bf16.xpose.msra.mxu0 %v1122_v39  ;;  %1159 = vmatpush1.bf16.xpose.msra.mxu1 %v1122_v39 }
 0x1e3   : > { %1126 = vmatprep.subr.msk.bf16.mxu0 %vm1887_vm2, %v1124_v19  ;;  %1144 = vmatprep.subr.msk.bf16.mxu1 %vm1887_vm2, %v1124_v19 }
 0x1ea   : > { %1128 = vmatpush1.bf16.xpose.msra.mxu0 %v1127_v38  ;;  %1160 = vmatpush1.bf16.xpose.msra.mxu1 %v1127_v38 }
 0x1f1   : > { %826 = vmatmul.mubr.f32.vlgmr.msra.gmra.mrb[0].mxu0 %v655_v7  ;;  %832 = vmatmul.mubr.f32.vlgmr.msra.gmra.mrb[0].mxu1 %v657_v27 }
 0x1f3   : > { %v852_v15 = vpop.permute.xlu1 %851  ;;  %v849_v22 = vpop.permute.xlu0 %848 }
 0x1f4   : > { %vm855_vm3 = vcmp.eq.s32.totalorder %v843_v30, %v852_v15  ;;  %vm856_vm4 = vcmp.eq.s32.totalorder %v844_v61, %v852_v15  ;;  %vm853_vm5 = vcmp.eq.s32.totalorder %v843_v30, %v849_v22  ;;  %vm854_vm6 = vcmp.eq.s32.totalorder %v844_v61, %v849_v22 }
 0x1f5   : > { %v863_v25 = vsel %vm855_vm3, 25.6, %v1405_v40  ;;  %v864_v26 = vsel %vm856_vm4, 25.6, %v1405_v40  ;;  %v861_v36 = vsel %vm853_vm5, 25.6, %v1405_v40 }
 0x1f6   : > { %v862_v28 = vsel %vm854_vm6, 25.6, %v1405_v40 }
 0x2c4   : > { %v827_v13 = vpop.f32.mrb[0].mxu0  ;;  %v833_v45 = vpop.f32.mrb[0].mxu1 }
 0x2c5   : > { %v857_v29 = vmul.f32 64.0, %v827_v13  ;;  %v859_v37 = vmul.f32 64.0, %v833_v45  ;;  %v829_v43 = vpop.f32.mrb[1].mxu0  ;;  %v835_v49 = vpop.f32.mrb[1].mxu1 }
 0x2c6   : > { %v858_v50 = vmul.f32 64.0, %v829_v43  ;;  %v860_v35 = vmul.f32 64.0, %v835_v49 }
 0x2c7   : > { %v867_v46 = vsub.f32 %v859_v37, %v863_v25  ;;  %v865_v47 = vsub.f32 %v857_v29, %v861_v36 }
 0x2c8   : > { %v866_v32 = vsub.f32 %v858_v50, %v862_v28  ;;  %v868_v52 = vsub.f32 %v860_v35, %v864_v26 }
 0x2c9   : > { %871 = vst [vmem:[%s1519_s22 + $0x10] sm:$0xff] %v867_v46  ;;  %869 = vst [vmem:[%s1519_s22] sm:$0xff] %v865_v47 }
 0x2ca   : > { %870 = vst [vmem:[%s1519_s22 + $0x8] sm:$0xff] %v866_v32  ;;  %872 = vst [vmem:[%s1519_s22 + $0x18] sm:$0xff] %v868_v52 }
 0x2cb   : > { %1321 = shalt.err (!%p1318_p9)
}
 0x2cc   : > { %s1322_s22 = scalar_lea.hbm %s2023_s9, 512  ;;  %s1326_s23 = scalar_lea.hbm %s2088_s3, 3072 }
 0x2cd   : > { %p1323_p10 = scmp.ne.s32.totalorder %s2023_s9, %s1322_s22  ;;  %p1327_p13 = scmp.lt.u32.totalorder %s2023_s9, %s2088_s3 }
 0x2ce   : > { %p1328_p0 = scmp.lt.u32.totalorder %s1326_s23, %s1322_s22  ;;  %p1330_p2 = scmp.lt.u32.totalorder %s1322_s22, %s2023_s9 }
 0x2cf   : > { %p1324_p11 = pnand %p1323_p10, %p1481_p3 }
 0x2d0   : > { %p1329_p1 = por %p1328_p0, %p1327_p13 }
 0x2d1   : > { %p1325_p12 = pneg %p1324_p11 }
 0x2d2   : > { %p1331_p4 = por %p1330_p2, %p1329_p1 }
 0x2d4   : > { %p1332_p5 = pnand %p1331_p4, %p1325_p12 }
 0x2d6   : > { %1335 = shalt.err (!%p1332_p5)
}
 0x2d7   : > { %s1407_s6 = smov 256   ;;  %s1408_s7 = smov 768  }
 0x2d8   : > { %s1409_s15 = smov 16  }
 0x2d9   : > { %1162 = dma.vmem_to_hbm [thread:$0]  (%p1481_p3), %s2025_s8, 512, %s2023_s9, %s2033_s11, %s1407_s6, %s1408_s7, %s1409_s15  }
 0x2da PF: > { %p1168_p6 = scmp.ge.s32.totalorder %s1402_s19, 2  ;;  %s905_s16 = sand.u32 1, %s1374_s12  }
 0x2db   : > { %s906_s10 = scalar_lea.sflag [#allocation4], %s905_s16 }
 0x2dc   : > { %p1165_p7 = pnand %p1168_p6, %p1490_p8 }
 0x2de   : > { %1369 = dma.done.wait (!%p1165_p7), %s906_s10, 512  }
 0x2df   : > { %1371 = vsyncadd (!%p1165_p7), %s906_s10, 4294966784  ;;  %s16_s19 = sadd.s32 1, %s1402_s19   ;;  %s2153_s25 = sld [smem:[#allocation6_spill]] }
 0x2e0   : > { %p13_p9 = scmp.ge.s32.totalorder %s16_s19, 8   ;;  %s2154_s8 = sld [smem:[#allocation7_spill]] }
 0x2e1   : > { %s2155_s12 = smov %s1378_s13  ;;  %s2156_s13 = smov %s1382_s14 }
 0x2e2   : > { %s2157_s14 = smov %s1499_s30  ;;  %s2158_s15 = smov %s1394_s17 }
 0x2e3   : > { %s2159_s16 = smov %s1398_s18  ;;  %15 = sbr.rel (!%p13_p9) target bundleno = 5 (0x5), region = 77 }
 0x2e5   : > { %s2160_s17 = smov %s2153_s25 }
 0x2e6   : > { %s2161_s18 = smov %s2154_s8 }
 0x2ea   :  { %911 = vsyncpa [#allocation4], 1 }
 0x2eb   :  { %913 = vsyncpa [#allocation4 + $0x1], 1 }

</bundles_post_ra>
